<compile_context>
chip_gen: v7x
topology: tpu7x:2x2x1
jax: 0.10.0
libtpu: 0.0.40
codegen_flags: <defaults>
</compile_context>

<pallas_src>
import math

import jax
import jax.numpy as jnp
from jax import lax
from jax.experimental import pallas as pl
from jax.experimental.pallas import tpu as pltpu

FACTORS = (64, 32, 16, 8)
BN_EPS = 1e-5
NORM_EPS = 1e-12
MAX_TILE_B = 8192   # cap sized for v7x (smallest VMEM); v5e/v6e could go one step larger
MIN_TILE_B = 128    # output block's last dim must be a multiple of the 128-lane width


# --------------------------------------------------------------------------------------
# Kernel: fused two-tower MLP, batch-on-lanes compute layout.
#   ue_ref / ie_ref : [TILE_B, 64] bf16 embeddings in natural layout
#   wN              : bf16 weights [F_out, F_in] (BN already folded in)
#   bN              : f32 biases [F_out, 1]
#   out_ref         : [1, TILE_B] f32 sigmoid(cosine(u, v))
# --------------------------------------------------------------------------------------
def dmf_kernel(ue_ref, ie_ref,
               w1u_ref, b1u_ref, w2u_ref, b2u_ref, w3u_ref, b3u_ref,
               w1i_ref, b1i_ref, w2i_ref, b2i_ref, w3i_ref, b3i_ref,
               out_ref):
    def tower(x, w1, b1, w2, b2, w3, b3):
        # First layer contracts over x's last (feature) axis: the operand "transpose"
        # happens on the MXU, and every activation / store is lane-dense [F_out, TILE_B].
        h = lax.dot_general(w1, x, (((1,), (1,)), ((), ())),
                            preferred_element_type=jnp.float32) + b1       # [32, TB] f32
        h = jnp.maximum(h, 0.0)
        h = jnp.dot(w2, h.astype(jnp.bfloat16),
                    preferred_element_type=jnp.float32) + b2               # [16, TB] f32
        h = jnp.maximum(h, 0.0)
        h = jnp.dot(w3, h.astype(jnp.bfloat16),
                    preferred_element_type=jnp.float32) + b3               # [8, TB] f32
        return h

    u = tower(ue_ref[...], w1u_ref[...], b1u_ref[...],
              w2u_ref[...], b2u_ref[...], w3u_ref[...], b3u_ref[...])
    v = tower(ie_ref[...], w1i_ref[...], b1i_ref[...],
              w2i_ref[...], b2i_ref[...], w3i_ref[...], b3i_ref[...])

    # cosine(u, v) with torch-style eps clamp on the norms, then sigmoid.
    uv = jnp.sum(u * v, axis=0, keepdims=True)                             # [1, TB]
    u_n = jnp.maximum(jnp.sqrt(jnp.sum(u * u, axis=0, keepdims=True)), NORM_EPS)
    v_n = jnp.maximum(jnp.sqrt(jnp.sum(v * v, axis=0, keepdims=True)), NORM_EPS)
    pred = uv * pl.reciprocal(u_n * v_n, approx=True)
    out_ref[...] = 1.0 / (1.0 + jnp.exp(-pred))   # exact divide keeps outputs in [0, 1]


# --------------------------------------------------------------------------------------
# Trace-time parameter preparation (outside the kernel).
# --------------------------------------------------------------------------------------
def _prep_tower(params):
    """Fold eval-mode BatchNorm1d into the *following* Linear; bf16 weights, f32 [F,1] biases."""
    (w1, b1, g1, be1, m1, v1,
     w2, b2, g2, be2, m2, v2,
     w3, b3) = params
    s1 = g1 * lax.rsqrt(v1 + BN_EPS)        # scale applied to BN1 input
    c1 = be1 - m1 * s1                      # shift applied to BN1 input
    w2f = w2 * s1[None, :]                  # [16, 32]
    b2f = b2 + w2 @ c1
    s2 = g2 * lax.rsqrt(v2 + BN_EPS)
    c2 = be2 - m2 * s2
    w3f = w3 * s2[None, :]                  # [8, 16]
    b3f = b3 + w3 @ c2
    prep = lambda w, b: (w.astype(jnp.bfloat16), b[:, None].astype(jnp.float32))
    return (*prep(w1, b1), *prep(w2f, b2f), *prep(w3f, b3f))


def _round_up(x, m):
    return ((x + m - 1) // m) * m


def _choose_tile(batch):
    # Biggest tile that fits the (v7x) VMEM budget; batch tail is padded in the wrapper.
    return max(MIN_TILE_B, min(MAX_TILE_B, _round_up(batch, MIN_TILE_B)))


# --------------------------------------------------------------------------------------
# Wrapper
# --------------------------------------------------------------------------------------
@jax.jit
def deep_mf_forward(user_ids, item_ids, user_emb_table, item_emb_table,
                    user_params, item_params):
    # Embedding gather stays in XLA; gather (+ batch-tail pad) fuses straight into the two
    # kernel operand buffers -- no concat, no transpose, no extra HBM pass.
    ue = jnp.take(user_emb_table, user_ids, axis=0).astype(jnp.bfloat16)   # [B, 64]
    ie = jnp.take(item_emb_table, item_ids, axis=0).astype(jnp.bfloat16)   # [B, 64]
    B, f0 = ue.shape

    params = (*_prep_tower(user_params), *_prep_tower(item_params))        # 12 small arrays

    tile_b = _choose_tile(B)
    b_pad = pl.cdiv(B, tile_b) * tile_b
    if b_pad != B:
        ue = jnp.pad(ue, ((0, b_pad - B), (0, 0)))
        ie = jnp.pad(ie, ((0, b_pad - B), (0, 0)))

    emb_spec = pl.BlockSpec((tile_b, f0), lambda i: (i, 0))                # batch-tiled
    full_spec = lambda a: pl.BlockSpec(a.shape, lambda i: (0, 0))          # VMEM-resident

    _, f1, f2, f3 = FACTORS
    param_bytes = sum(int(p.size) * p.dtype.itemsize for p in params)
    cost = pl.CostEstimate(
        flops=2 * 2 * (f0 * f1 + f1 * f2 + f2 * f3) * b_pad + 40 * b_pad,
        transcendentals=2 * b_pad,
        bytes_accessed=b_pad * (2 * f0 * 2 + 4) + param_bytes)             # memory-bound hint

    out = pl.pallas_call(
        dmf_kernel,
        out_shape=jax.ShapeDtypeStruct((1, b_pad), jnp.float32),
        grid_spec=pltpu.PrefetchScalarGridSpec(
            num_scalar_prefetch=0,
            grid=(b_pad // tile_b,),
            in_specs=[emb_spec, emb_spec] + [full_spec(p) for p in params],
            out_specs=pl.BlockSpec((1, tile_b), lambda i: (0, i)),         # lane-dense output
        ),
        compiler_params=pltpu.CompilerParams(
            dimension_semantics=("parallel",)),
        cost_estimate=cost,
    )(ue, ie, *params)
    return out[0, :B]                                                      # [B]


# --------------------------------------------------------------------------------------
# Pure-JAX reference (f32, unfolded BN) for validation.
# --------------------------------------------------------------------------------------
def _tower_ref(x, params):
    (w1, b1, g1, be1, m1, v1, w2, b2, g2, be2, m2, v2, w3, b3) = params
    h = x @ w1.T + b1
    h = jnp.maximum(h, 0.0)
    h = (h - m1) * lax.rsqrt(v1 + BN_EPS) * g1 + be1
    h = h @ w2.T + b2
    h = jnp.maximum(h, 0.0)
    h = (h - m2) * lax.rsqrt(v2 + BN_EPS) * g2 + be2
    return h @ w3.T + b3


def deep_mf_reference(user_ids, item_ids, user_emb_table, item_emb_table,
                      user_params, item_params):
    u = _tower_ref(jnp.take(user_emb_table, user_ids, axis=0).astype(jnp.float32), user_params)
    v = _tower_ref(jnp.take(item_emb_table, item_ids, axis=0).astype(jnp.float32), item_params)
    un = jnp.maximum(jnp.linalg.norm(u, axis=1, keepdims=True), NORM_EPS)
    vn = jnp.maximum(jnp.linalg.norm(v, axis=1, keepdims=True), NORM_EPS)
    return jax.nn.sigmoid(jnp.sum((u / un) * (v / vn), axis=1))


# --------------------------------------------------------------------------------------
# Parameter init.  Linear layers match PyTorch (xavier_uniform_ weights, zero biases);
# BatchNorm stats/affine are mildly non-trivial so the BN-folding path is exercised.
# --------------------------------------------------------------------------------------
def xavier_uniform(key, fan_out, fan_in):
    limit = math.sqrt(6.0 / (fan_in + fan_out))
    return jax.random.uniform(key, (fan_out, fan_in), jnp.float32, -limit, limit)


def init_tower_params(key, factors=FACTORS):
    k1, k2, k3, kb1, kb2 = jax.random.split(key, 5)
    f0, f1, f2, f3 = factors

    def bn(k, n):
        kg, kbeta, km, kv = jax.random.split(k, 4)
        gamma = 1.0 + 0.1 * jax.random.normal(kg, (n,), jnp.float32)
        beta = 0.05 * jax.random.normal(kbeta, (n,), jnp.float32)
        mean = 0.1 * jax.random.normal(km, (n,), jnp.float32)
        var = 1.0 + 0.5 * jax.random.uniform(kv, (n,), jnp.float32)
        return gamma, beta, mean, var

    return [
        xavier_uniform(k1, f1, f0), jnp.zeros((f1,), jnp.float32),   # L1 w, b
        *bn(kb1, f1),                                                # BN1 gamma, beta, mean, var
        xavier_uniform(k2, f2, f1), jnp.zeros((f2,), jnp.float32),   # L2 w, b
        *bn(kb2, f2),                                                # BN2 gamma, beta, mean, var
        xavier_uniform(k3, f3, f2), jnp.zeros((f3,), jnp.float32),   # L3 w, b
    ]


if __name__ == "__main__":
    key = jax.random.PRNGKey(0)
    k_ue, k_ie, k_ut, k_it, k_uid, k_iid = jax.random.split(key, 6)

    n_users, n_items = 50, 40
    batch = 8

    # nn.Embedding default init: N(0, 1).  Tables are served to the kernel in bf16 to
    # halve HBM traffic on the memory-bound embedding path; the reference uses f32.
    user_emb_f32 = jax.random.normal(k_ue, (n_users, FACTORS[0]), jnp.float32)
    item_emb_f32 = jax.random.normal(k_ie, (n_items, FACTORS[0]), jnp.float32)
    user_emb_bf16 = user_emb_f32.astype(jnp.bfloat16)
    item_emb_bf16 = item_emb_f32.astype(jnp.bfloat16)

    user_params = init_tower_params(k_ut)
    item_params = init_tower_params(k_it)

    user_ids = jax.random.randint(k_uid, (batch,), 0, n_users)
    item_ids = jax.random.randint(k_iid, (batch,), 0, n_items)

    preds = deep_mf_forward(user_ids, item_ids, user_emb_bf16, item_emb_bf16,
                            user_params, item_params)
    preds = jax.block_until_ready(preds)

    ref = deep_mf_reference(user_ids, item_ids, user_emb_f32, item_emb_f32,
                            user_params, item_params)

    assert preds.shape == (batch,)
    assert bool(jnp.all(jnp.isfinite(preds)))
    assert bool(jnp.all((preds >= 0.0) & (preds <= 1.0)))
    assert bool(jnp.max(jnp.abs(preds - ref)) < 5e-2), "kernel output deviates from f32 reference"
    print("KERNEL_OK")
</pallas_src>

<mosaic_0001>
module attributes {stable_mosaic.version = 11 : i64} {
  func.func @dmf_kernel(%arg0: i32, %arg1: memref<128x64xbf16, #tpu.memory_space<vmem>>, %arg2: memref<128x64xbf16, #tpu.memory_space<vmem>>, %arg3: memref<32x64xbf16, #tpu.memory_space<vmem>>, %arg4: memref<32x1xf32, #tpu.memory_space<vmem>>, %arg5: memref<16x32xbf16, #tpu.memory_space<vmem>>, %arg6: memref<16x1xf32, #tpu.memory_space<vmem>>, %arg7: memref<8x16xbf16, #tpu.memory_space<vmem>>, %arg8: memref<8x1xf32, #tpu.memory_space<vmem>>, %arg9: memref<32x64xbf16, #tpu.memory_space<vmem>>, %arg10: memref<32x1xf32, #tpu.memory_space<vmem>>, %arg11: memref<16x32xbf16, #tpu.memory_space<vmem>>, %arg12: memref<16x1xf32, #tpu.memory_space<vmem>>, %arg13: memref<8x16xbf16, #tpu.memory_space<vmem>>, %arg14: memref<8x1xf32, #tpu.memory_space<vmem>>, %arg15: memref<1x128xf32, #tpu.memory_space<vmem>>) attributes {dimension_semantics = [#tpu.dimension_semantics<parallel>], iteration_bounds = array<i64: 1>, scalar_prefetch = 0 : i64, scratch_operands = 0 : i64, tpu.core_type = #tpu.core_type<tc>, window_params = [{transform_indices = @transform_0, window_bounds = array<i64: 128, 64>}, {transform_indices = @transform_1, window_bounds = array<i64: 128, 64>}, {pipeline_mode = #tpu.pipeline_mode<synchronous>, transform_indices = @transform_2, window_bounds = array<i64: 32, 64>}, {pipeline_mode = #tpu.pipeline_mode<synchronous>, transform_indices = @transform_3, window_bounds = array<i64: 32, 1>}, {pipeline_mode = #tpu.pipeline_mode<synchronous>, transform_indices = @transform_4, window_bounds = array<i64: 16, 32>}, {pipeline_mode = #tpu.pipeline_mode<synchronous>, transform_indices = @transform_5, window_bounds = array<i64: 16, 1>}, {pipeline_mode = #tpu.pipeline_mode<synchronous>, transform_indices = @transform_6, window_bounds = array<i64: 8, 16>}, {pipeline_mode = #tpu.pipeline_mode<synchronous>, transform_indices = @transform_7, window_bounds = array<i64: 8, 1>}, {pipeline_mode = #tpu.pipeline_mode<synchronous>, transform_indices = @transform_8, window_bounds = array<i64: 32, 64>}, {pipeline_mode = #tpu.pipeline_mode<synchronous>, transform_indices = @transform_9, window_bounds = array<i64: 32, 1>}, {pipeline_mode = #tpu.pipeline_mode<synchronous>, transform_indices = @transform_10, window_bounds = array<i64: 16, 32>}, {pipeline_mode = #tpu.pipeline_mode<synchronous>, transform_indices = @transform_11, window_bounds = array<i64: 16, 1>}, {pipeline_mode = #tpu.pipeline_mode<synchronous>, transform_indices = @transform_12, window_bounds = array<i64: 8, 16>}, {pipeline_mode = #tpu.pipeline_mode<synchronous>, transform_indices = @transform_13, window_bounds = array<i64: 8, 1>}, {transform_indices = @transform_14, window_bounds = array<i64: 1, 128>}]} {
    %c0 = arith.constant 0 : index
    %c0_0 = arith.constant 0 : index
    %0 = vector.load %arg1[%c0, %c0_0] : memref<128x64xbf16, #tpu.memory_space<vmem>>, vector<128x64xbf16>
    %c0_1 = arith.constant 0 : index
    %c0_2 = arith.constant 0 : index
    %1 = vector.load %arg3[%c0_1, %c0_2] : memref<32x64xbf16, #tpu.memory_space<vmem>>, vector<32x64xbf16>
    %c0_3 = arith.constant 0 : index
    %c0_4 = arith.constant 0 : index
    %2 = vector.load %arg4[%c0_3, %c0_4] : memref<32x1xf32, #tpu.memory_space<vmem>>, vector<32x1xf32>
    %c0_5 = arith.constant 0 : index
    %c0_6 = arith.constant 0 : index
    %3 = vector.load %arg5[%c0_5, %c0_6] : memref<16x32xbf16, #tpu.memory_space<vmem>>, vector<16x32xbf16>
    %c0_7 = arith.constant 0 : index
    %c0_8 = arith.constant 0 : index
    %4 = vector.load %arg6[%c0_7, %c0_8] : memref<16x1xf32, #tpu.memory_space<vmem>>, vector<16x1xf32>
    %c0_9 = arith.constant 0 : index
    %c0_10 = arith.constant 0 : index
    %5 = vector.load %arg7[%c0_9, %c0_10] : memref<8x16xbf16, #tpu.memory_space<vmem>>, vector<8x16xbf16>
    %c0_11 = arith.constant 0 : index
    %c0_12 = arith.constant 0 : index
    %6 = vector.load %arg8[%c0_11, %c0_12] : memref<8x1xf32, #tpu.memory_space<vmem>>, vector<8x1xf32>
    %cst = arith.constant dense<0.000000e+00> : vector<32x128xf32>
    %7 = tpu.matmul %1, %0, %cst {dimension_numbers = #tpu.dot_dimension_numbers<[1], [1], [0], [0], [0, 0, 1, 0], [], []>} : vector<32x64xbf16>, vector<128x64xbf16>, vector<32x128xf32> -> vector<32x128xf32>
    %8 = vector.broadcast %2 : vector<32x1xf32> to vector<32x128xf32>
    %9 = arith.addf %7, %8 : vector<32x128xf32>
    %cst_13 = arith.constant 0.000000e+00 : f32
    %10 = vector.broadcast %cst_13 : f32 to vector<32x128xf32>
    %11 = arith.maximumf %9, %10 : vector<32x128xf32>
    %12 = arith.truncf %11 : vector<32x128xf32> to vector<32x128xbf16>
    %cst_14 = arith.constant dense<0.000000e+00> : vector<16x128xf32>
    %13 = tpu.matmul %3, %12, %cst_14 {dimension_numbers = #tpu.dot_dimension_numbers<[1], [0], [0], [1], [0, 0, 1, 1], [], []>} : vector<16x32xbf16>, vector<32x128xbf16>, vector<16x128xf32> -> vector<16x128xf32>
    %14 = vector.broadcast %4 : vector<16x1xf32> to vector<16x128xf32>
    %15 = arith.addf %13, %14 : vector<16x128xf32>
    %cst_15 = arith.constant 0.000000e+00 : f32
    %16 = vector.broadcast %cst_15 : f32 to vector<16x128xf32>
    %17 = arith.maximumf %15, %16 : vector<16x128xf32>
    %18 = arith.truncf %17 : vector<16x128xf32> to vector<16x128xbf16>
    %cst_16 = arith.constant dense<0.000000e+00> : vector<8x128xf32>
    %19 = tpu.matmul %5, %18, %cst_16 {dimension_numbers = #tpu.dot_dimension_numbers<[1], [0], [0], [1], [0, 0, 1, 1], [], []>} : vector<8x16xbf16>, vector<16x128xbf16>, vector<8x128xf32> -> vector<8x128xf32>
    %20 = vector.broadcast %6 : vector<8x1xf32> to vector<8x128xf32>
    %21 = arith.addf %19, %20 : vector<8x128xf32>
    %c0_17 = arith.constant 0 : index
    %c0_18 = arith.constant 0 : index
    %22 = vector.load %arg2[%c0_17, %c0_18] : memref<128x64xbf16, #tpu.memory_space<vmem>>, vector<128x64xbf16>
    %c0_19 = arith.constant 0 : index
    %c0_20 = arith.constant 0 : index
    %23 = vector.load %arg9[%c0_19, %c0_20] : memref<32x64xbf16, #tpu.memory_space<vmem>>, vector<32x64xbf16>
    %c0_21 = arith.constant 0 : index
    %c0_22 = arith.constant 0 : index
    %24 = vector.load %arg10[%c0_21, %c0_22] : memref<32x1xf32, #tpu.memory_space<vmem>>, vector<32x1xf32>
    %c0_23 = arith.constant 0 : index
    %c0_24 = arith.constant 0 : index
    %25 = vector.load %arg11[%c0_23, %c0_24] : memref<16x32xbf16, #tpu.memory_space<vmem>>, vector<16x32xbf16>
    %c0_25 = arith.constant 0 : index
    %c0_26 = arith.constant 0 : index
    %26 = vector.load %arg12[%c0_25, %c0_26] : memref<16x1xf32, #tpu.memory_space<vmem>>, vector<16x1xf32>
    %c0_27 = arith.constant 0 : index
    %c0_28 = arith.constant 0 : index
    %27 = vector.load %arg13[%c0_27, %c0_28] : memref<8x16xbf16, #tpu.memory_space<vmem>>, vector<8x16xbf16>
    %c0_29 = arith.constant 0 : index
    %c0_30 = arith.constant 0 : index
    %28 = vector.load %arg14[%c0_29, %c0_30] : memref<8x1xf32, #tpu.memory_space<vmem>>, vector<8x1xf32>
    %cst_31 = arith.constant dense<0.000000e+00> : vector<32x128xf32>
    %29 = tpu.matmul %23, %22, %cst_31 {dimension_numbers = #tpu.dot_dimension_numbers<[1], [1], [0], [0], [0, 0, 1, 0], [], []>} : vector<32x64xbf16>, vector<128x64xbf16>, vector<32x128xf32> -> vector<32x128xf32>
    %30 = vector.broadcast %24 : vector<32x1xf32> to vector<32x128xf32>
    %31 = arith.addf %29, %30 : vector<32x128xf32>
    %cst_32 = arith.constant 0.000000e+00 : f32
    %32 = vector.broadcast %cst_32 : f32 to vector<32x128xf32>
    %33 = arith.maximumf %31, %32 : vector<32x128xf32>
    %34 = arith.truncf %33 : vector<32x128xf32> to vector<32x128xbf16>
    %cst_33 = arith.constant dense<0.000000e+00> : vector<16x128xf32>
    %35 = tpu.matmul %25, %34, %cst_33 {dimension_numbers = #tpu.dot_dimension_numbers<[1], [0], [0], [1], [0, 0, 1, 1], [], []>} : vector<16x32xbf16>, vector<32x128xbf16>, vector<16x128xf32> -> vector<16x128xf32>
    %36 = vector.broadcast %26 : vector<16x1xf32> to vector<16x128xf32>
    %37 = arith.addf %35, %36 : vector<16x128xf32>
    %cst_34 = arith.constant 0.000000e+00 : f32
    %38 = vector.broadcast %cst_34 : f32 to vector<16x128xf32>
    %39 = arith.maximumf %37, %38 : vector<16x128xf32>
    %40 = arith.truncf %39 : vector<16x128xf32> to vector<16x128xbf16>
    %cst_35 = arith.constant dense<0.000000e+00> : vector<8x128xf32>
    %41 = tpu.matmul %27, %40, %cst_35 {dimension_numbers = #tpu.dot_dimension_numbers<[1], [0], [0], [1], [0, 0, 1, 1], [], []>} : vector<8x16xbf16>, vector<16x128xbf16>, vector<8x128xf32> -> vector<8x128xf32>
    %42 = vector.broadcast %28 : vector<8x1xf32> to vector<8x128xf32>
    %43 = arith.addf %41, %42 : vector<8x128xf32>
    %44 = arith.mulf %21, %43 : vector<8x128xf32>
    %cst_36 = arith.constant dense<0.000000e+00> : vector<128xf32>
    %45 = vector.multi_reduction <add>, %44, %cst_36 [0] : vector<8x128xf32> to vector<128xf32>
    %46 = vector.shape_cast %45 : vector<128xf32> to vector<1x128xf32>
    %47 = arith.mulf %21, %21 : vector<8x128xf32>
    %cst_37 = arith.constant dense<0.000000e+00> : vector<128xf32>
    %48 = vector.multi_reduction <add>, %47, %cst_37 [0] : vector<8x128xf32> to vector<128xf32>
    %49 = vector.shape_cast %48 : vector<128xf32> to vector<1x128xf32>
    %50 = math.sqrt %49 : vector<1x128xf32>
    %cst_38 = arith.constant 9.99999996E-13 : f32
    %51 = vector.broadcast %cst_38 : f32 to vector<1x128xf32>
    %52 = arith.maximumf %50, %51 : vector<1x128xf32>
    %53 = arith.mulf %43, %43 : vector<8x128xf32>
    %cst_39 = arith.constant dense<0.000000e+00> : vector<128xf32>
    %54 = vector.multi_reduction <add>, %53, %cst_39 [0] : vector<8x128xf32> to vector<128xf32>
    %55 = vector.shape_cast %54 : vector<128xf32> to vector<1x128xf32>
    %56 = math.sqrt %55 : vector<1x128xf32>
    %cst_40 = arith.constant 9.99999996E-13 : f32
    %57 = vector.broadcast %cst_40 : f32 to vector<1x128xf32>
    %58 = arith.maximumf %56, %57 : vector<1x128xf32>
    %59 = arith.mulf %52, %58 : vector<1x128xf32>
    %60 = tpu.reciprocal %59 {approx = true} : vector<1x128xf32> -> vector<1x128xf32>
    %61 = arith.mulf %46, %60 : vector<1x128xf32>
    %cst_41 = arith.constant 0.000000e+00 : f32
    %62 = vector.broadcast %cst_41 : f32 to vector<1x128xf32>
    %63 = arith.subf %62, %61 : vector<1x128xf32>
    %64 = math.exp %63 : vector<1x128xf32>
    %cst_42 = arith.constant 1.000000e+00 : f32
    %65 = vector.broadcast %cst_42 : f32 to vector<1x128xf32>
    %66 = arith.addf %65, %64 : vector<1x128xf32>
    %cst_43 = arith.constant 1.000000e+00 : f32
    %67 = vector.broadcast %cst_43 : f32 to vector<1x128xf32>
    %68 = arith.divf %67, %66 : vector<1x128xf32>
    %c0_44 = arith.constant 0 : index
    %c0_45 = arith.constant 0 : index
    %69 = vector.load %arg15[%c0_44, %c0_45] : memref<1x128xf32, #tpu.memory_space<vmem>>, vector<1x128xf32>
    tpu.vector_store %arg15[%c0_44, %c0_45], %68 {strides = array<i32>} : memref<1x128xf32, #tpu.memory_space<vmem>>, vector<1x128xf32>,
    return
  }
  func.func @transform_0(%arg0: i32) -> (i32, i32) {
    %c0_i32 = arith.constant 0 : i32
    %c0_i32_0 = arith.constant 0 : i32
    return %arg0, %c0_i32 : i32, i32
  }
  func.func @transform_1(%arg0: i32) -> (i32, i32) {
    %c0_i32 = arith.constant 0 : i32
    %c0_i32_0 = arith.constant 0 : i32
    return %arg0, %c0_i32 : i32, i32
  }
  func.func @transform_2(%arg0: i32) -> (i32, i32) {
    %c0_i32 = arith.constant 0 : i32
    %c0_i32_0 = arith.constant 0 : i32
    %c0_i32_1 = arith.constant 0 : i32
    return %c0_i32, %c0_i32_0 : i32, i32
  }
  func.func @transform_3(%arg0: i32) -> (i32, i32) {
    %c0_i32 = arith.constant 0 : i32
    %c0_i32_0 = arith.constant 0 : i32
    %c0_i32_1 = arith.constant 0 : i32
    return %c0_i32, %c0_i32_0 : i32, i32
  }
  func.func @transform_4(%arg0: i32) -> (i32, i32) {
    %c0_i32 = arith.constant 0 : i32
    %c0_i32_0 = arith.constant 0 : i32
    %c0_i32_1 = arith.constant 0 : i32
    return %c0_i32, %c0_i32_0 : i32, i32
  }
  func.func @transform_5(%arg0: i32) -> (i32, i32) {
    %c0_i32 = arith.constant 0 : i32
    %c0_i32_0 = arith.constant 0 : i32
    %c0_i32_1 = arith.constant 0 : i32
    return %c0_i32, %c0_i32_0 : i32, i32
  }
  func.func @transform_6(%arg0: i32) -> (i32, i32) {
    %c0_i32 = arith.constant 0 : i32
    %c0_i32_0 = arith.constant 0 : i32
    %c0_i32_1 = arith.constant 0 : i32
    return %c0_i32, %c0_i32_0 : i32, i32
  }
  func.func @transform_7(%arg0: i32) -> (i32, i32) {
    %c0_i32 = arith.constant 0 : i32
    %c0_i32_0 = arith.constant 0 : i32
    %c0_i32_1 = arith.constant 0 : i32
    return %c0_i32, %c0_i32_0 : i32, i32
  }
  func.func @transform_8(%arg0: i32) -> (i32, i32) {
    %c0_i32 = arith.constant 0 : i32
    %c0_i32_0 = arith.constant 0 : i32
    %c0_i32_1 = arith.constant 0 : i32
    return %c0_i32, %c0_i32_0 : i32, i32
  }
  func.func @transform_9(%arg0: i32) -> (i32, i32) {
    %c0_i32 = arith.constant 0 : i32
    %c0_i32_0 = arith.constant 0 : i32
    %c0_i32_1 = arith.constant 0 : i32
    return %c0_i32, %c0_i32_0 : i32, i32
  }
  func.func @transform_10(%arg0: i32) -> (i32, i32) {
    %c0_i32 = arith.constant 0 : i32
    %c0_i32_0 = arith.constant 0 : i32
    %c0_i32_1 = arith.constant 0 : i32
    return %c0_i32, %c0_i32_0 : i32, i32
  }
  func.func @transform_11(%arg0: i32) -> (i32, i32) {
    %c0_i32 = arith.constant 0 : i32
    %c0_i32_0 = arith.constant 0 : i32
    %c0_i32_1 = arith.constant 0 : i32
    return %c0_i32, %c0_i32_0 : i32, i32
  }
  func.func @transform_12(%arg0: i32) -> (i32, i32) {
    %c0_i32 = arith.constant 0 : i32
    %c0_i32_0 = arith.constant 0 : i32
    %c0_i32_1 = arith.constant 0 : i32
    return %c0_i32, %c0_i32_0 : i32, i32
  }
  func.func @transform_13(%arg0: i32) -> (i32, i32) {
    %c0_i32 = arith.constant 0 : i32
    %c0_i32_0 = arith.constant 0 : i32
    %c0_i32_1 = arith.constant 0 : i32
    return %c0_i32, %c0_i32_0 : i32, i32
  }
  func.func @transform_14(%arg0: i32) -> (i32, i32) {
    %c0_i32 = arith.constant 0 : i32
    %c0_i32_0 = arith.constant 0 : i32
    return %c0_i32, %arg0 : i32, i32
  }
}

</mosaic_0001>

<bundles_post_ra>
// kernel: deep_mf_forward.1
= control target key start
LH: loop header
LB: loop body
LE: loop exit
PB: predicated region body
PF: predicated region fallthrough
CT: control target
= control target key end

     0   :  { %vm148_vm0 = vcmask 523264   ;;  %v873_v1 = vmov 0   ;;  %v874_v33 = vmov 0.0   ;;  %vm875_vm1 = vmmov 0   ;;  %s1122_s0 = inlined_call_operand.vmem [shape: bf16[128,64], index: 0, kind: input, shape index: {}]   ;;  %s1123_s2 = inlined_call_operand.vmem [shape: bf16[32,64], index: 2, kind: input, shape index: {}]   ;;  %s1124_s3 = inlined_call_operand.vmem [shape: f32[32,1], index: 3, kind: input, shape index: {}]   ;;  %s1125_s5 = inlined_call_operand.vmem [shape: f32[16,1], index: 5, kind: input, shape index: {}]   ;;  %s1126_s9 = inlined_call_operand.vmem [shape: f32[32,1], index: 9, kind: input, shape index: {}]   ;;  %s1127_s11 = inlined_call_operand.vmem [shape: f32[16,1], index: 11, kind: input, shape index: {}]   ;;  %s1128_s7 = inlined_call_operand.vmem [shape: f32[8,1], index: 7, kind: input, shape index: {}]   ;;  %s1129_s13 = inlined_call_operand.vmem [shape: f32[8,1], index: 13, kind: input, shape index: {}]   ;;  %s1130_s4 = inlined_call_operand.vmem [shape: bf16[16,32], index: 4, kind: input, shape index: {}]   ;;  %s1131_s1 = inlined_call_operand.vmem [shape: bf16[128,64], index: 1, kind: input, shape index: {}]   ;;  %s1132_s8 = inlined_call_operand.vmem [shape: bf16[32,64], index: 8, kind: input, shape index: {}]   ;;  %s1133_s6 = inlined_call_operand.vmem [shape: bf16[8,16], index: 6, kind: input, shape index: {}]   ;;  %s1134_s10 = inlined_call_operand.vmem [shape: bf16[16,32], index: 10, kind: input, shape index: {}]   ;;  %s1135_s12 = inlined_call_operand.vmem [shape: bf16[8,16], index: 12, kind: input, shape index: {}]   ;;  %s1136_s14 = inlined_call_operand.vmem [shape: f32[1,128], index: 14, kind: output, shape index: {}]  }
   0x1   :  { %v841_v0 = vld [vmem:[%s1122_s0] sm:$0xff]   ;;  %839 = vset.pattern.permute.xlu0 %v873_v1  ;;  %840 = vset.pattern.permute.xlu1 %v873_v1  ;;  %v842_v2 = vld [vmem:[%s1122_s0 + $0x8] sm:$0xff]   ;;  %v843_v4 = vld [vmem:[%s1122_s0 + $0x10] sm:$0xff]   ;;  %vm249_vm2 = vcmask 261120   ;;  %vm302_vm3 = vcmask 130048  }
   0x2   :  { %820 = vmatprep.subr.msk.bf16.mxu0 %vm148_vm0, %v841_v0  ;;  %v156_v3 = vsel %vm148_vm0, %v841_v0, 0  ;;  %v159_v5 = vsel %vm148_vm0, %v842_v2, 0  ;;  %v849_v6 = vld [vmem:[%s1123_s2] sm:$0xff]   ;;  %v70_v8 = vld [vmem:[%s1124_s3 + $0x10] sm:$0xff]  ;;  %v69_v9 = vld [vmem:[%s1124_s3 + $0x8] sm:$0xff]  ;;  %v162_v11 = vsel %vm148_vm0, %v843_v4, 0  ;;  %772 = vmatprep.subr.bf16.mxu1 %v874_v33 }
   0x3   :  { %753 = vmatpush3.bf16.xpose.msra.mxu0 %v156_v3  ;;  %768 = vmatprep.mubr.msk.bf16.mxu0 %vm148_vm0, %v849_v6  ;;  %v68_v7 = vld [vmem:[%s1124_s3] sm:$0xff]  ;;  %v71_v10 = vld [vmem:[%s1124_s3 + $0x18] sm:$0xff]  ;;  %v75_v14 = vld [vmem:[%s1125_s5 + $0x8] sm:$0xff] }
   0x4   :  { %821 = vmatprep.subr.msk.bf16.mxu0 %vm148_vm0, %v842_v2  ;;  %80 = vperm.xlu0 %839, %v68_v7   ;;  %v844_v12 = vld [vmem:[%s1122_s0 + $0x18] sm:$0xff]   ;;  %v74_v13 = vld [vmem:[%s1125_s5] sm:$0xff]  ;;  %v367_v16 = vld [vmem:[%s1126_s9 + $0x8] sm:$0xff] }
   0x5   :  { %90 = vperm.xlu1 %840, %v70_v8   ;;  %v366_v15 = vld [vmem:[%s1126_s9] sm:$0xff]  ;;  %v165_v17 = vsel %vm148_vm0, %v844_v12, 0  ;;  %v368_v19 = vld [vmem:[%s1126_s9 + $0x10] sm:$0xff]  ;;  %v369_v20 = vld [vmem:[%s1126_s9 + $0x18] sm:$0xff]  ;;  %776 = vmatprep.mubr.msk.bf16.mxu1 %vm875_vm1, %v874_v33 }
   0x6   :  { %v845_v18 = vld [vmem:[%s1122_s0 + $0x20] sm:$0xff]   ;;  %v373_v22 = vld [vmem:[%s1127_s11 + $0x8] sm:$0xff]  ;;  %v847_v28 = vld [vmem:[%s1122_s0 + $0x30] sm:$0xff]  }
   0x7   :  { %v372_v21 = vld [vmem:[%s1127_s11] sm:$0xff]  ;;  %v168_v23 = vsel %vm148_vm0, %v845_v18, 0  ;;  %v846_v24 = vld [vmem:[%s1122_s0 + $0x28] sm:$0xff]   ;;  %v174_v29 = vsel %vm148_vm0, %v847_v28, 0  ;;  %v848_v30 = vld [vmem:[%s1122_s0 + $0x38] sm:$0xff]  }
   0x8   :  { %85 = vperm.xlu0 %839, %v69_v9   ;;  %v77_v25 = vld [vmem:[%s1128_s7] sm:$0xff]  ;;  %v171_v27 = vsel %vm148_vm0, %v846_v24, 0  ;;  %v177_v31 = vsel %vm148_vm0, %v848_v30, 0  ;;  %v850_v32 = vld [vmem:[%s1123_s2 + $0x8] sm:$0xff]   ;;  %v854_v6 = vld [vmem:[%s1131_s1 + $0x10] sm:$0xff]  }
   0x9   :  { %95 = vperm.xlu1 %840, %v71_v10   ;;  %v375_v26 = vld [vmem:[%s1129_s13] sm:$0xff]  ;;  %v459_v7 = vsel %vm148_vm0, %v854_v6, 0  ;;  %v855_v8 = vld [vmem:[%s1131_s1 + $0x18] sm:$0xff]  }
   0xa   :  { %v851_v52 = vld [vmem:[%s1130_s4] sm:$0xff]   ;;  %v462_v9 = vsel %vm148_vm0, %v855_v8, 0 }
   0xb   :  { %755 = vmatpush3.bf16.xpose.msra.mxu0 %v159_v5  ;;  %v852_v63 = vld [vmem:[%s1131_s1] sm:$0xff]  }
   0xc   :  { %822 = vmatprep.subr.msk.bf16.mxu0 %vm148_vm0, %v843_v4  ;;  %236 = vperm.xlu0 %839, %v74_v13   ;;  %v76_v1 = vld [vmem:[%s1133_s6] sm:$0xf]  ;;  %v453_v3 = vsel %vm148_vm0, %v852_v63, 0  ;;  %v853_v4 = vld [vmem:[%s1131_s1 + $0x8] sm:$0xff]  }
   0xd   :  { %241 = vperm.xlu1 %840, %v75_v14   ;;  %v860_v2 = vld [vmem:[%s1132_s8] sm:$0xff]   ;;  %v456_v5 = vsel %vm148_vm0, %v853_v4, 0  ;;  %v858_v14 = vld [vmem:[%s1131_s1 + $0x30] sm:$0xff]  }
   0xe   :  { %v856_v10 = vld [vmem:[%s1131_s1 + $0x20] sm:$0xff]  }
  0x10   :  { %378 = vperm.xlu0 %839, %v366_v15   ;;  %v471_v15 = vsel %vm148_vm0, %v858_v14, 0 }
  0x11   :  { %383 = vperm.xlu1 %840, %v367_v16   ;;  %v859_v16 = vld [vmem:[%s1131_s1 + $0x38] sm:$0xff]  }
  0x13   :  { %757 = vmatpush3.bf16.xpose.msra.mxu0 %v162_v11  ;;  %v465_v11 = vsel %vm148_vm0, %v856_v10, 0 }
  0x14   :  { %823 = vmatprep.subr.msk.bf16.mxu0 %vm148_vm0, %v844_v12  ;;  %388 = vperm.xlu0 %839, %v368_v19   ;;  %v857_v12 = vld [vmem:[%s1131_s1 + $0x28] sm:$0xff]  }
  0x15   :  { %393 = vperm.xlu1 %840, %v369_v20   ;;  %v468_v13 = vsel %vm148_vm0, %v857_v12, 0 }
  0x18   :  { %533 = vperm.xlu0 %839, %v372_v21  }
  0x19   :  { %538 = vperm.xlu1 %840, %v373_v22  }
  0x1b   :  { %759 = vmatpush3.bf16.xpose.msra.mxu0 %v165_v17  ;;  %v474_v17 = vsel %vm148_vm0, %v859_v16, 0 }
  0x1c   :  { %824 = vmatprep.subr.msk.bf16.mxu0 %vm148_vm0, %v845_v18  ;;  %299 = vperm.xlu0 %839, %v77_v25   ;;  %v861_v18 = vld [vmem:[%s1132_s8 + $0x8] sm:$0xff]  }
  0x1d   :  { %595 = vperm.xlu1 %840, %v375_v26  }
  0x23   :  { %761 = vmatpush3.bf16.xpose.msra.mxu0 %v168_v23 }
  0x24   :  { %825 = vmatprep.subr.msk.bf16.mxu0 %vm148_vm0, %v846_v24 }
  0x2b   :  { %763 = vmatpush3.bf16.xpose.msra.mxu0 %v171_v27 }
  0x2c   :  { %826 = vmatprep.subr.msk.bf16.mxu0 %vm148_vm0, %v847_v28 }
  0x33   :  { %765 = vmatpush3.bf16.xpose.msra.mxu0 %v174_v29 }
  0x34   :  { %827 = vmatprep.subr.msk.bf16.mxu0 %vm148_vm0, %v848_v30 }
  0x3b   :  { %767 = vmatpush3.bf16.xpose.msra.mxu0 %v177_v31 }
  0x3c   :  { %806 = vmatprep.subr.bf16.mxu0 %v874_v33 }
  0x42   :  { %769 = vmatmul.mubr.msk.bf16.vlgmr.msra.gmra.mrb[0].mxu0 %vm148_vm0, %v850_v32 }
  0x43   :  { %810 = vmatprep.mubr.msk.bf16.mxu0 %vm875_vm1, %v874_v33 }
  0x83   :  { %v81_v35 = vpop.permute.xlu0 %80 }
  0x84   :  { %v91_v34 = vpop.permute.xlu1 %90 }
  0x87   :  { %v86_v42 = vpop.permute.xlu0 %85 }
  0x88   :  { %v96_v39 = vpop.permute.xlu1 %95 }
  0x8b   :  { %v237_v53 = vpop.permute.xlu0 %236 }
  0x8c   :  { %v242_v57 = vpop.permute.xlu1 %241 }
  0x8f   :  { %v379_v23 = vpop.permute.xlu0 %378 }
  0x90   :  { %v384_v24 = vpop.permute.xlu1 %383 }
  0x93   :  { %v389_v25 = vpop.permute.xlu0 %388 }
  0x94   :  { %v394_v29 = vpop.permute.xlu1 %393 }
 0x115   :  { %v770_v36 = vpop.f32.mrb[0].mxu0 }
 0x116   :  { %v222_v37 = vadd.f32 %v770_v36, %v91_v34  ;;  %v213_v38 = vpop.f32.mrb[1].mxu0 }
 0x117   :  { %v214_v40 = vadd.f32 %v213_v38, %v81_v35  ;;  %v771_v41 = vpop.f32.mrb[2].mxu0 }
 0x118   :  { %v225_v43 = vadd.f32 %v771_v41, %v96_v39  ;;  %v216_v44 = vpop.f32.mrb[3].mxu0  ;;  %v230_v46 = vmax.f32 %v222_v37, 0.0 }
 0x119   :  { %v217_v45 = vadd.f32 %v216_v44, %v86_v42  ;;  %v228_v48 = vmax.f32 %v214_v40, 0.0  ;;  %v862_v42 = vld [vmem:[%s1134_s10] sm:$0xff]  }
 0x11a   :  { %v231_v47 = vmax.f32 %v225_v43, 0.0  ;;  %v534_v43 = vpop.permute.xlu0 %533 }
 0x11b   :  { %v229_v49 = vmax.f32 %v217_v45, 0.0 }
 0x11c   :  { %v233_v50 = vpack.c.bf16 %v231_v47, %v230_v46  ;;  %v539_v47 = vpop.permute.xlu1 %538 }
 0x11d   :  { %v232_v51 = vpack.c.bf16 %v229_v49, %v228_v48 }
 0x11f   :  { %773 = vmatpush3.bf16.msra.mxu1 %v232_v51 }
 0x120   :  { %774 = vmatprep.subr.bf16.mxu1 %v874_v33 }
 0x123   :  { %775 = vmatpush3.bf16.msra.mxu1 %v233_v50 }
 0x124   :  { %780 = vmatprep.subr.bf16.mxu1 %v874_v33 }
 0x126   :  { %777 = vmatmul.mubr.msk.bf16.vlgmr.msra.gmra.mrb[0].mxu1 %vm249_vm2, %v851_v52 }
 0x127   :  { %782 = vmatprep.mubr.msk.bf16.mxu1 %vm875_vm1, %v874_v33 }
 0x1f9   :  { %v287_v54 = vpop.f32.mrb[0].mxu1 }
 0x1fa   :  { %v288_v55 = vadd.f32 %v287_v54, %v237_v53  ;;  %v778_v56 = vpop.f32.mrb[1].mxu1  ;;  %v374_v54 = vld [vmem:[%s1135_s12] sm:$0xf] }
 0x1fb   :  { %v290_v58 = vpop.f32.mrb[2].mxu1 }
 0x1fc   :  { %v291_v59 = vadd.f32 %v290_v58, %v242_v57  ;;  %v779_v60 = vpop.f32.mrb[3].mxu1  ;;  %v294_v61 = vmax.f32 %v288_v55, 0.0  ;;  %v300_v55 = vpop.permute.xlu0 %299 }
 0x1fe   :  { %v295_v62 = vmax.f32 %v291_v59, 0.0 }
 0x200   :  { %v296_v0 = vpack.c.bf16 %v295_v62, %v294_v61  ;;  %v596_v61 = vpop.permute.xlu1 %595 }
 0x202   :  { %781 = vmatpush3.bf16.msra.mxu1 %v296_v0 }
 0x203   :  { %828 = vmatprep.subr.msk.bf16.mxu1 %vm148_vm0, %v852_v63 }
 0x205   :  { %783 = vmatmul.mubr.msk.bf16.vlgmr.msra.gmra.mrb[4].mxu1 %vm302_vm3, %v76_v1 }
 0x206   :  { %802 = vmatprep.mubr.msk.bf16.mxu1 %vm148_vm0, %v860_v2 }
 0x20b   :  { %787 = vmatpush3.bf16.xpose.msra.mxu1 %v453_v3 }
 0x20c   :  { %829 = vmatprep.subr.msk.bf16.mxu1 %vm148_vm0, %v853_v4 }
 0x213   :  { %789 = vmatpush3.bf16.xpose.msra.mxu1 %v456_v5 }
 0x214   :  { %830 = vmatprep.subr.msk.bf16.mxu1 %vm148_vm0, %v854_v6 }
 0x21b   :  { %791 = vmatpush3.bf16.xpose.msra.mxu1 %v459_v7 }
 0x21c   :  { %831 = vmatprep.subr.msk.bf16.mxu1 %vm148_vm0, %v855_v8 }
 0x223   :  { %793 = vmatpush3.bf16.xpose.msra.mxu1 %v462_v9 }
 0x224   :  { %832 = vmatprep.subr.msk.bf16.mxu1 %vm148_vm0, %v856_v10 }
 0x22b   :  { %795 = vmatpush3.bf16.xpose.msra.mxu1 %v465_v11 }
 0x22c   :  { %833 = vmatprep.subr.msk.bf16.mxu1 %vm148_vm0, %v857_v12 }
 0x233   :  { %797 = vmatpush3.bf16.xpose.msra.mxu1 %v468_v13 }
 0x234   :  { %834 = vmatprep.subr.msk.bf16.mxu1 %vm148_vm0, %v858_v14 }
 0x23b   :  { %799 = vmatpush3.bf16.xpose.msra.mxu1 %v471_v15 }
 0x23c   :  { %835 = vmatprep.subr.msk.bf16.mxu1 %vm148_vm0, %v859_v16 }
 0x243   :  { %801 = vmatpush3.bf16.xpose.msra.mxu1 %v474_v17 }
 0x24a   :  { %803 = vmatmul.mubr.msk.bf16.vlgmr.msra.gmra.mrb[8].mxu1 %vm148_vm0, %v861_v18 }
 0x2d8   :  { %v340_v19 = vpop.f32.mrb[4].mxu1 }
 0x2d9   :  { %v784_v20 = vpop.f32.mrb[5].mxu1 }
 0x2da   :  { %v343_v21 = vpop.f32.mrb[6].mxu1 }
 0x2db   :  { %v785_v22 = vpop.f32.mrb[7].mxu1 }
 0x31d   :  { %v804_v26 = vpop.f32.mrb[8].mxu1 }
 0x31e   :  { %v519_v27 = vadd.f32 %v804_v26, %v389_v25  ;;  %v510_v28 = vpop.f32.mrb[9].mxu1 }
 0x31f   :  { %v511_v30 = vadd.f32 %v510_v28, %v379_v23  ;;  %v805_v31 = vpop.f32.mrb[10].mxu1 }
 0x320   :  { %v522_v32 = vadd.f32 %v805_v31, %v394_v29  ;;  %v513_v34 = vpop.f32.mrb[11].mxu1  ;;  %v527_v36 = vmax.f32 %v519_v27, 0.0 }
 0x321   :  { %v514_v35 = vadd.f32 %v513_v34, %v384_v24  ;;  %v525_v38 = vmax.f32 %v511_v30, 0.0 }
 0x322   :  { %v528_v37 = vmax.f32 %v522_v32, 0.0 }
 0x323   :  { %v526_v39 = vmax.f32 %v514_v35, 0.0 }
 0x324   :  { %v530_v40 = vpack.c.bf16 %v528_v37, %v527_v36 }
 0x325   :  { %v529_v41 = vpack.c.bf16 %v526_v39, %v525_v38 }
 0x327   :  { %807 = vmatpush3.bf16.msra.mxu0 %v529_v41 }
 0x328   :  { %808 = vmatprep.subr.bf16.mxu0 %v874_v33 }
 0x32b   :  { %809 = vmatpush3.bf16.msra.mxu0 %v530_v40 }
 0x32c   :  { %814 = vmatprep.subr.bf16.mxu0 %v874_v33 }
 0x32e   :  { %811 = vmatmul.mubr.msk.bf16.vlgmr.msra.gmra.mrb[4].mxu0 %vm249_vm2, %v862_v42 }
 0x32f   :  { %816 = vmatprep.mubr.msk.bf16.mxu0 %vm875_vm1, %v874_v33  ;;  %v341_v33 = vadd.f32 %v340_v19, %v300_v55 }
 0x331   :  { %v648_v56 = vmul.f32 %v341_v33, %v341_v33 }
 0x333   :  { %v649_v57 = vrot.slane %v648_v56, 4 }
 0x335   :  { %v650_v58 = vadd.f32 %v649_v57, %v648_v56 }
 0x337   :  { %v651_v59 = vrot.slane %v650_v58, 2 }
 0x339   :  { %v652_v60 = vadd.f32 %v651_v59, %v650_v58 }
 0x33b   :  { %v653_v63 = vrot.slane %v652_v60, 1 }
 0x33d   :  { %v654_v6 = vadd.f32 %v653_v63, %v652_v60 }
 0x33f   :  { %863 = vrsqrt.f32 %v654_v6  ;;  %vm657_vm4 = vcmp.eq.f32.partialorder %v654_v6, inf  ;;  %v660_v18 = vand.u32 2147483648, %v654_v6  ;;  %vm659_vm5 = vcmp.eq.f32.partialorder %v654_v6, 0.0 }
 0x349   :  { %v864_v13 = vpop.eup %863 }
 0x34a   :  { %v656_v14 = vmul.f32 %v864_v13, %v654_v6 }
 0x34c   :  { %v658_v16 = vsel %vm657_vm4, %v654_v6, %v656_v14 }
 0x34d   :  { %v661_v21 = vsel %vm659_vm5, %v660_v18, %v658_v16 }
 0x34e   :  { %v662_v25 = vmax.f32 %v661_v21, 1e-12 }
 0x401   :  { %v583_v44 = vpop.f32.mrb[4].mxu0 }
 0x402   :  { %v584_v45 = vadd.f32 %v583_v44, %v534_v43  ;;  %v812_v46 = vpop.f32.mrb[5].mxu0 }
 0x403   :  { %v586_v48 = vpop.f32.mrb[6].mxu0 }
 0x404   :  { %v587_v49 = vadd.f32 %v586_v48, %v539_v47  ;;  %v813_v50 = vpop.f32.mrb[7].mxu0  ;;  %v590_v51 = vmax.f32 %v584_v45, 0.0 }
 0x406   :  { %v591_v52 = vmax.f32 %v587_v49, 0.0 }
 0x408   :  { %v592_v53 = vpack.c.bf16 %v591_v52, %v590_v51 }
 0x40a   :  { %815 = vmatpush3.bf16.msra.mxu0 %v592_v53 }
 0x40d   :  { %817 = vmatmul.mubr.msk.bf16.vlgmr.msra.gmra.mrb[8].mxu0 %vm302_vm3, %v374_v54 }
 0x4e0   :  { %v635_v62 = vpop.f32.mrb[8].mxu0 }
 0x4e1   :  { %v636_v0 = vadd.f32 %v635_v62, %v596_v61  ;;  %v818_v1 = vpop.f32.mrb[9].mxu0 }
 0x4e2   :  { %v638_v2 = vpop.f32.mrb[10].mxu0 }
 0x4e3   :  { %v641_v3 = vmul.f32 %v636_v0, %v341_v33  ;;  %v663_v4 = vmul.f32 %v636_v0, %v636_v0  ;;  %v819_v5 = vpop.f32.mrb[11].mxu0 }
 0x4e5   :  { %v664_v7 = vrot.slane %v663_v4, 4  ;;  %v642_v15 = vrot.slane %v641_v3, 4 }
 0x4e7   :  { %v665_v8 = vadd.f32 %v664_v7, %v663_v4  ;;  %v643_v20 = vadd.f32 %v642_v15, %v641_v3 }
 0x4e9   :  { %v666_v9 = vrot.slane %v665_v8, 2  ;;  %v644_v27 = vrot.slane %v643_v20, 2 }
 0x4eb   :  { %v667_v10 = vadd.f32 %v666_v9, %v665_v8  ;;  %v645_v29 = vadd.f32 %v644_v27, %v643_v20 }
 0x4ed   :  { %v668_v11 = vrot.slane %v667_v10, 1  ;;  %v646_v30 = vrot.slane %v645_v29, 1 }
 0x4ef   :  { %v669_v12 = vadd.f32 %v668_v11, %v667_v10  ;;  %v647_v31 = vadd.f32 %v646_v30, %v645_v29 }
 0x4f1   :  { %865 = vrsqrt.f32 %v669_v12  ;;  %vm672_vm6 = vcmp.eq.f32.partialorder %v669_v12, inf  ;;  %v675_v22 = vand.u32 2147483648, %v669_v12  ;;  %vm674_vm7 = vcmp.eq.f32.partialorder %v669_v12, 0.0 }
 0x4fb   :  { %v866_v17 = vpop.eup %865 }
 0x4fc   :  { %v671_v19 = vmul.f32 %v866_v17, %v669_v12 }
 0x4fe   :  { %v673_v23 = vsel %vm672_vm6, %v669_v12, %v671_v19 }
 0x4ff   :  { %v676_v24 = vsel %vm674_vm7, %v675_v22, %v673_v23 }
 0x500   :  { %v677_v26 = vmax.f32 %v676_v24, 1e-12 }
 0x502   :  { %v678_v28 = vmul.f32 %v677_v26, %v662_v25 }
 0x504   :  { %867 = vrcp.f32 %v678_v28 }
 0x50e   :  { %v868_v32 = vpop.eup %867 }
 0x50f   :  { %v680_v34 = vmul.f32 %v868_v32, %v647_v31 }
 0x511   :  { %v681_v35 = vsub.f32 0.0, %v680_v34 }
 0x513   :  { %v682_v36 = vmul.f32 1.442695, %v681_v35 }
 0x515   :  { %869 = vpow2.f32 %v682_v36 }
 0x51f   :  { %v870_v37 = vpop.eup %869 }
 0x520   :  { %v684_v38 = vadd.f32 1.0, %v870_v37 }
 0x522   :  { %871 = vrcp.f32 %v684_v38 }
 0x52c   :  { %v872_v39 = vpop.eup %871 }
 0x52d   :  { %687 = vst [vmem:[%s1136_s14] sm:$0x1] %v872_v39 }

</bundles_post_ra>
